<compile_context>
chip_gen: v6e
topology: v6e:2x2x1
jax: 0.10.0
libtpu: 0.0.40
codegen_flags: <defaults>
</compile_context>

<pallas_src>
import functools
import math

import jax
import jax.numpy as jnp
from jax.experimental import pallas as pl
from jax.experimental.pallas import tpu as pltpu


def _cdiv(a, b):
    return -(-a // b)


def _round_up(x, m):
    return _cdiv(x, m) * m


def _sublane(dtype):
    # Native sublane packing: 8 rows for 4-byte, 16 for 2-byte, 32 for 1-byte.
    return max(8, 32 // jnp.dtype(dtype).itemsize)


def _gen_params():
    """(target_block_bytes, vmem_limit_cap, two_tensorcores) per TPU generation."""
    vmem_cap = 128 << 20
    try:
        vmem_cap = int(pltpu.get_tpu_info().vmem_capacity_bytes)
    except Exception:
        pass
    if vmem_cap <= (64 << 20):
        # v7x-class: ~3.2 TB/s HBM per TC -> bigger blocks to amortize the
        # ~0.35 us per-grid-step overhead; 2 double-buffered blocks stay well
        # under the 64 MiB physical VMEM.  2 TensorCores per chip.
        return (12 << 20), (48 << 20), True
    # v5e / v6e: 128 MiB VMEM, 0.8-1.4 TB/s HBM -> 8 MiB blocks are already at
    # the roofline plateau; don't waste scoped VMEM.
    return (8 << 20), (40 << 20), False


def _vmem_limit(limit_cap, in_block_bytes):
    # 2 double-buffered input blocks + resident out/bias blocks + headroom.
    return int(min(limit_cap, max(32 << 20, 2 * in_block_bytes + (16 << 20))))


# ---------------------------------------------------------------------------
# channels_first (NCHW): rows = B*C on sublanes, H*W on lanes.
# ---------------------------------------------------------------------------
def _plv_rows_kernel(x_ref, bias_ref, out_ref, *, hw, hw_tile, needs_mask):
    # x_ref:    (TR, HW_TILE)  native dtype
    # bias_ref: (TR, 1)        float32 per-row threshold (resident across k)
    # out_ref:  (TR, 1)        float32; index_map ignores k -> resident, used
    #                          directly as the accumulator (no scratch).
    k = pl.program_id(1)
    last = pl.num_programs(1) - 1

    @pl.when(k == 0)
    def _init():
        out_ref[...] = jnp.zeros_like(out_ref)

    gt = x_ref[...] > bias_ref[...]          # compare in f32 (x promoted)

    if needs_mask:
        # Only the final spatial tile is ragged; mask only there.
        @pl.when(k == last)
        def _acc_masked():
            col = k * hw_tile + jax.lax.broadcasted_iota(jnp.int32, gt.shape, 1)
            gtm = jnp.logical_and(gt, col < hw)
            out_ref[...] += jnp.sum(gtm.astype(jnp.float32), axis=-1, keepdims=True)

        @pl.when(k != last)
        def _acc():
            out_ref[...] += jnp.sum(gt.astype(jnp.float32), axis=-1, keepdims=True)
    else:
        out_ref[...] += jnp.sum(gt.astype(jnp.float32), axis=-1, keepdims=True)

    @pl.when(k == last)
    def _finalize():
        out_ref[...] *= (1.0 / hw)


def _plv_pooling_nchw(x, bias_f32, block_bytes=None):
    B, C, H, W = x.shape
    hw = H * W
    r = B * C
    itemsize = jnp.dtype(x.dtype).itemsize

    target, limit_cap, two_cores = _gen_params()
    if block_bytes is not None:                 # test / tuning override
        target = int(block_bytes)
    sub = _sublane(x.dtype)

    x_rows = x.reshape(r, hw)                          # free row-major reshape
    bias_rows = jnp.tile(bias_f32, B).reshape(r, 1)    # per-row threshold (tiny)

    hw_pad = _round_up(hw, 128)                 # lane footprint in VMEM
    r_pad = _round_up(r, sub)

    if hw_pad * sub * itemsize >= target:
        # Large spatial extent: tile the lanes; rows stay modest.
        tr = min(r_pad, 256)
        hw_tile = max(128, (target // (tr * itemsize)) // 128 * 128)
        if hw_tile >= hw:
            hw_tile = hw
    else:
        # Whole spatial extent fits in one lane block; grow the row tile to
        # fill the byte budget (small feature maps would otherwise be
        # grid-overhead bound).
        hw_tile = hw
        tr = (target // (hw_pad * itemsize)) // sub * sub
        tr = max(sub, min(tr, r_pad))

    # v7x megacore: give the 'parallel' row axis >= 2 blocks when possible so
    # both TensorCores get work (half-sized blocks are still multi-MiB).
    if two_cores and tr >= r and r > sub:
        tr = max(sub, _round_up(_cdiv(r, 2), sub))

    needs_mask = (hw_tile < hw) and (hw % hw_tile != 0)
    grid = (_cdiv(r, tr), _cdiv(hw, hw_tile))
    in_block_bytes = tr * _round_up(hw_tile, 128) * itemsize

    kernel = functools.partial(
        _plv_rows_kernel, hw=hw, hw_tile=hw_tile, needs_mask=needs_mask)

    out = pl.pallas_call(
        kernel,
        out_shape=jax.ShapeDtypeStruct((r, 1), jnp.float32),
        grid_spec=pltpu.PrefetchScalarGridSpec(
            num_scalar_prefetch=0,
            grid=grid,
            in_specs=[
                pl.BlockSpec((tr, hw_tile), lambda i, k: (i, k)),
                pl.BlockSpec((tr, 1), lambda i, k: (i, 0)),
            ],
            out_specs=pl.BlockSpec((tr, 1), lambda i, k: (i, 0)),
        ),
        compiler_params=pltpu.CompilerParams(
            dimension_semantics=("parallel", "arbitrary"),
            vmem_limit_bytes=_vmem_limit(limit_cap, in_block_bytes),
        ),
        cost_estimate=pl.CostEstimate(
            flops=2 * r * hw,
            transcendentals=0,
            bytes_accessed=r * hw * itemsize + r * 4 + r * 4,
        ),
    )(x_rows, bias_rows)

    return out.reshape(B, C)


# ---------------------------------------------------------------------------
# channels_last (NHWC): per-batch data viewed as (q, L) with L a multiple of C
# (and of 128 whenever lcm(C,128) divides H*W*C), so lanes stay dense even for
# tiny C.  channel == lane % C; the per-channel fold happens in the wrapper.
# ---------------------------------------------------------------------------
def _plv_nhwc_kernel(x_ref, bias_ref, out_ref, *, q, hw, ts, needs_mask):
    # x_ref:    (1, TS, L)  native dtype
    # bias_ref: (1, L)      float32 per-lane threshold (resident)
    # out_ref:  (1, L)      float32; index_map ignores s -> resident accumulator
    s = pl.program_id(1)
    last = pl.num_programs(1) - 1

    @pl.when(s == 0)
    def _init():
        out_ref[...] = jnp.zeros_like(out_ref)

    gt = x_ref[0] > bias_ref[...]            # (TS, L), compare in f32

    if needs_mask:
        # Only the final spatial tile is ragged; mask only there.
        @pl.when(s == last)
        def _acc_masked():
            row = s * ts + jax.lax.broadcasted_iota(jnp.int32, gt.shape, 0)
            gtm = jnp.logical_and(gt, row < q)
            out_ref[...] += jnp.sum(gtm.astype(jnp.float32), axis=0, keepdims=True)

        @pl.when(s != last)
        def _acc():
            out_ref[...] += jnp.sum(gt.astype(jnp.float32), axis=0, keepdims=True)
    else:
        out_ref[...] += jnp.sum(gt.astype(jnp.float32), axis=0, keepdims=True)

    @pl.when(s == last)
    def _finalize():
        out_ref[...] *= (1.0 / hw)


def _plv_pooling_nhwc(x, bias_f32, block_bytes=None):
    B, H, W, C = x.shape
    hw = H * W
    itemsize = jnp.dtype(x.dtype).itemsize

    target, limit_cap, two_cores = _gen_params()
    if block_bytes is not None:                 # test / tuning override
        target = int(block_bytes)
    sub = _sublane(x.dtype)

    # Lane chunk L: a multiple of C so channel == lane % C.  When lcm(C,128)
    # divides hw*C the chunk is also a multiple of 128 -> fully lane-dense even
    # for tiny C.  Otherwise fall back to L == C (correct, lane-padded).
    need = 128 // math.gcd(C, 128)              # lcm(C, 128) == C * need
    if hw % need == 0:
        L = C * need
    else:
        # TODO(synk): awkward (C, H*W) combos (e.g. C=3, hw=49) keep the
        # lane-padded layout; a masked flat-1D tiling would restore density.
        L = C
    q = (hw * C) // L                           # rows of the per-batch (q, L) view

    x3 = x.reshape(B, q, L)                     # free row-major reshape
    bias_lanes = jnp.tile(bias_f32, L // C).reshape(1, L)

    L_pad = _round_up(L, 128)
    q_pad = _round_up(q, sub)
    ts = (target // (L_pad * itemsize)) // sub * sub
    ts = max(sub, min(ts, q_pad))
    if ts >= q:
        ts = q
        needs_mask = False
    else:
        needs_mask = (q % ts) != 0

    # TODO(synk): when B == 1 the 'parallel' axis has a single block and one
    # v7x TensorCore idles; splitting the spatial reduction into two partial
    # accumulators + a trivial combine would recover it.

    grid = (B, _cdiv(q, ts))
    in_block_bytes = ts * L_pad * itemsize

    kernel = functools.partial(
        _plv_nhwc_kernel, q=q, hw=hw, ts=ts, needs_mask=needs_mask)

    out_lanes = pl.pallas_call(
        kernel,
        out_shape=jax.ShapeDtypeStruct((B, L), jnp.float32),
        grid_spec=pltpu.PrefetchScalarGridSpec(
            num_scalar_prefetch=0,
            grid=grid,
            in_specs=[
                pl.BlockSpec((1, ts, L), lambda b, s: (b, s, 0)),
                pl.BlockSpec((1, L), lambda b, s: (0, 0)),
            ],
            out_specs=pl.BlockSpec((1, L), lambda b, s: (b, 0)),
        ),
        compiler_params=pltpu.CompilerParams(
            dimension_semantics=("parallel", "arbitrary"),
            vmem_limit_bytes=_vmem_limit(limit_cap, in_block_bytes),
        ),
        cost_estimate=pl.CostEstimate(
            flops=2 * B * hw * C,
            transcendentals=0,
            bytes_accessed=B * hw * C * itemsize + L * 4 + B * L * 4,
        ),
    )(x3, bias_lanes)

    # Tiny per-channel fold (B*L f32 elements) of the per-lane means.
    return out_lanes.reshape(B, L // C, C).sum(axis=1)


def plv_pooling(x, bias, channels_first=True, *, block_bytes=None):
    """PLVPooling forward.

    x:    (B, C, H, W) if channels_first else (B, H, W, C)
    bias: (C,)  (bias of the preceding conv layer)
    returns (B, C) float32
    """
    bias_f32 = bias.astype(jnp.float32)   # threshold in f32 (PyTorch promotion)
    if channels_first:
        return _plv_pooling_nchw(x, bias_f32, block_bytes=block_bytes)
    return _plv_pooling_nhwc(x, bias_f32, block_bytes=block_bytes)


if __name__ == "__main__":
    key = jax.random.PRNGKey(0)
    kx, kb = jax.random.split(key)

    def ref_nchw(x, bias):
        C = x.shape[1]
        return jnp.mean((x > bias.reshape(1, C, 1, 1)).astype(jnp.float32), axis=(2, 3))

    def ref_nhwc(x, bias):
        C = x.shape[-1]
        return jnp.mean((x > bias.reshape(1, 1, 1, C)).astype(jnp.float32), axis=(1, 2))

    # 1) channels_first (default): B=2, C=4, 16x16
    B, C, H, W = 2, 4, 16, 16
    x = jax.random.normal(kx, (B, C, H, W), dtype=jnp.float32)
    bias = jax.random.normal(kb, (C,), dtype=jnp.float32) * 0.1
    out = jax.block_until_ready(plv_pooling(x, bias, channels_first=True))
    assert out.shape == (B, C)
    assert jnp.allclose(out, ref_nchw(x, bias), atol=1e-6), (out, ref_nchw(x, bias))

    # 2) channels_first, tiny block budget -> exercises lane-tiled spatial
    #    reduction with a ragged (masked) last tile.
    x2 = jax.random.normal(kx, (2, 4, 16, 12), dtype=jnp.float32)   # hw = 192
    out2 = jax.block_until_ready(
        plv_pooling(x2, bias, channels_first=True, block_bytes=4096))
    assert jnp.allclose(out2, ref_nchw(x2, bias), atol=1e-6)

    # 3) channels_first with ragged row count (B*C not a multiple of 8)
    b3 = jax.random.normal(kb, (5,), dtype=jnp.float32) * 0.1
    x3 = jax.random.normal(kx, (3, 5, 8, 8), dtype=jnp.float32)
    out3 = jax.block_until_ready(plv_pooling(x3, b3, channels_first=True))
    assert jnp.allclose(out3, ref_nchw(x3, b3), atol=1e-6)

    # 4) channels_last, small C -> lane-flattened path (L = lcm(C,128) = 128)
    x4 = jnp.transpose(x, (0, 2, 3, 1))   # transpose only builds the test input
    out4 = jax.block_until_ready(plv_pooling(x4, bias, channels_first=False))
    assert jnp.allclose(out4, ref_nhwc(x4, bias), atol=1e-6)

    # 5) channels_last fallback (lcm(C,128) does not divide H*W*C)
    b5 = jax.random.normal(kb, (3,), dtype=jnp.float32) * 0.1
    x5 = jax.random.normal(kx, (2, 7, 7, 3), dtype=jnp.float32)
    out5 = jax.block_until_ready(plv_pooling(x5, b5, channels_first=False))
    assert jnp.allclose(out5, ref_nhwc(x5, b5), atol=1e-6)

    print("KERNEL_OK")
</pallas_src>

<mosaic_0001>
module attributes {stable_mosaic.version = 11 : i64} {
  func.func @_plv_rows_kernel(%arg0: i32, %arg1: i32, %arg2: memref<8x256xf32, #tpu.memory_space<vmem>>, %arg3: memref<8x1xf32, #tpu.memory_space<vmem>>, %arg4: memref<8x1xf32, #tpu.memory_space<vmem>>) attributes {dimension_semantics = [#tpu.dimension_semantics<parallel>, #tpu.dimension_semantics<arbitrary>], iteration_bounds = array<i64: 1, 1>, scalar_prefetch = 0 : i64, scratch_operands = 0 : i64, tpu.core_type = #tpu.core_type<tc>, window_params = [{transform_indices = @transform_0, window_bounds = array<i64: 8, 256>}, {transform_indices = @transform_1, window_bounds = array<i64: 8, 1>}, {transform_indices = @transform_2, window_bounds = array<i64: 8, 1>}]} {
    %c0_i32 = arith.constant 0 : i32
    %0 = arith.cmpi eq, %arg1, %c0_i32 : i32
    %1 = arith.extui %0 : i1 to i32
    %c0_i32_0 = arith.constant 0 : i32
    %2 = arith.cmpi ne, %1, %c0_i32_0 : i32
    scf.if %2 {
      %cst_10 = arith.constant 0.000000e+00 : f32
      %17 = vector.broadcast %cst_10 : f32 to vector<8x1xf32>
      %c0_11 = arith.constant 0 : index
      %c0_12 = arith.constant 0 : index
      %18 = vector.load %arg4[%c0_11, %c0_12] : memref<8x1xf32, #tpu.memory_space<vmem>>, vector<8x1xf32>
      tpu.vector_store %arg4[%c0_11, %c0_12], %17 {strides = array<i32>} : memref<8x1xf32, #tpu.memory_space<vmem>>, vector<8x1xf32>,
    } else {
    }
    %c0 = arith.constant 0 : index
    %c0_1 = arith.constant 0 : index
    %3 = vector.load %arg2[%c0, %c0_1] : memref<8x256xf32, #tpu.memory_space<vmem>>, vector<8x256xf32>
    %c0_2 = arith.constant 0 : index
    %c0_3 = arith.constant 0 : index
    %4 = vector.load %arg3[%c0_2, %c0_3] : memref<8x1xf32, #tpu.memory_space<vmem>>, vector<8x1xf32>
    %5 = vector.broadcast %4 : vector<8x1xf32> to vector<8x256xf32>
    %6 = arith.cmpf ogt, %3, %5 : vector<8x256xf32>
    %c0_4 = arith.constant 0 : index
    %c0_5 = arith.constant 0 : index
    %7 = vector.load %arg4[%c0_4, %c0_5] : memref<8x1xf32, #tpu.memory_space<vmem>>, vector<8x1xf32>
    %8 = arith.extui %6 : vector<8x256xi1> to vector<8x256xi32>
    %9 = arith.sitofp %8 : vector<8x256xi32> to vector<8x256xf32>
    %cst = arith.constant dense<0.000000e+00> : vector<8xf32>
    %10 = vector.multi_reduction <add>, %9, %cst [1] : vector<8x256xf32> to vector<8xf32>
    %11 = vector.shape_cast %10 : vector<8xf32> to vector<8x1xf32>
    %12 = arith.addf %7, %11 : vector<8x1xf32>
    %c0_6 = arith.constant 0 : index
    %c0_7 = arith.constant 0 : index
    %13 = vector.load %arg4[%c0_6, %c0_7] : memref<8x1xf32, #tpu.memory_space<vmem>>, vector<8x1xf32>
    tpu.vector_store %arg4[%c0_6, %c0_7], %12 {strides = array<i32>} : memref<8x1xf32, #tpu.memory_space<vmem>>, vector<8x1xf32>,
    %c0_i32_8 = arith.constant 0 : i32
    %14 = arith.cmpi eq, %arg1, %c0_i32_8 : i32
    %15 = arith.extui %14 : i1 to i32
    %c0_i32_9 = arith.constant 0 : i32
    %16 = arith.cmpi ne, %15, %c0_i32_9 : i32
    scf.if %16 {
      %c0_10 = arith.constant 0 : index
      %c0_11 = arith.constant 0 : index
      %17 = vector.load %arg4[%c0_10, %c0_11] : memref<8x1xf32, #tpu.memory_space<vmem>>, vector<8x1xf32>
      %cst_12 = arith.constant 3.906250e-03 : f32
      %18 = vector.broadcast %cst_12 : f32 to vector<8x1xf32>
      %19 = arith.mulf %17, %18 : vector<8x1xf32>
      %c0_13 = arith.constant 0 : index
      %c0_14 = arith.constant 0 : index
      %20 = vector.load %arg4[%c0_13, %c0_14] : memref<8x1xf32, #tpu.memory_space<vmem>>, vector<8x1xf32>
      tpu.vector_store %arg4[%c0_13, %c0_14], %19 {strides = array<i32>} : memref<8x1xf32, #tpu.memory_space<vmem>>, vector<8x1xf32>,
    } else {
    }
    return
  }
  func.func @transform_0(%arg0: i32, %arg1: i32) -> (i32, i32) {
    %c0_i32 = arith.constant 0 : i32
    return %arg0, %arg1 : i32, i32
  }
  func.func @transform_1(%arg0: i32, %arg1: i32) -> (i32, i32) {
    %c0_i32 = arith.constant 0 : i32
    %c0_i32_0 = arith.constant 0 : i32
    return %arg0, %c0_i32 : i32, i32
  }
  func.func @transform_2(%arg0: i32, %arg1: i32) -> (i32, i32) {
    %c0_i32 = arith.constant 0 : i32
    %c0_i32_0 = arith.constant 0 : i32
    return %arg0, %c0_i32 : i32, i32
  }
}

</mosaic_0001>

<bundles_post_ra>
// kernel: tpu_custom_call.1
= control target key start
LH: loop header
LB: loop body
LE: loop exit
PB: predicated region body
PF: predicated region fallthrough
CT: control target
= control target key end

     0   :  { %7 = vsyncpa [#allocation3], 0  ;;  %s89_s9 = smov [#allocation2]   ;;  %s131_s0 = inlined_call_operand.hbm [shape: f32[8,256], index: 0, kind: input, shape index: {}]   ;;  %s132_s1 = inlined_call_operand.vmem [shape: f32[8,1], index: 1, kind: input, shape index: {}]   ;;  %s133_s2 = inlined_call_operand.vmem [shape: f32[8,1], index: 2, kind: output, shape index: {}]  }
   0x1   :  { %s14_s10 = sshll.u32 %s89_s9, 4  ;;  %s15_s10 = int_to_ptr.vmem [resolvable:$true] %s14_s10 }
   0x2   :  { %s75_s11 = scalar_lea.vmem %s15_s10, 256  ;;  %p80_p1 = scmp.lt.s32.totalorder %s15_s10, %s15_s10 }
   0x3   :  { %p76_p0 = scmp.ne.s32.totalorder %s15_s10, %s75_s11  ;;  %p81_p2 = scmp.lt.s32.totalorder %s75_s11, %s75_s11 }
   0x5   :  { %p82_p3 = por %p81_p2, %p80_p1 }
   0x7   :  { %p83_p4 = pnand %p82_p3, %p76_p0 }
   0x9   :  { %86 = shalt.err (!%p83_p4)
}
   0xa   :  { %17 = dma.hbm_to_vmem [thread:$0]  %s131_s0, 256, %s15_s10, [#allocation3]  }
   0xb   :  { %87 = dma.done.wait [#allocation3], 256  }
   0xc   :  { %88 = vsyncadd [#allocation3], 4294967040  ;;  %v90_v0 = vmov 0   ;;  %vm27_vm0 = vcmask 7168   ;;  %v91_v1 = vmov 0.0   ;;  %v31_v2 = vld [vmem:[%s132_s1] sm:$0xff] }
   0xd   :  { %66 = vset.pattern.permute.xlu0 %v90_v0  ;;  %28 = vst.msk [vmem:[%s133_s2] sm:$0xff] %vm27_vm0, %v91_v1  ;;  %v29_v3 = vld [vmem:[#allocation2] sm:$0xff]  ;;  %v30_v4 = vld [vmem:[#allocation2 + $0x8] sm:$0xff] }
   0xe   :  { %34 = vperm.xlu0 %66, %v31_v2  }
  0x14   :  { %v39_v9 = vld [vmem:[%s133_s2] sm:$0xff] }
  0x89   :  { %v35_v5 = vpop.permute.xlu0 %34 }
  0x8a   :  { %vm37_vm1 = vcmp.gt.f32.partialorder %v29_v3, %v35_v5  ;;  %vm38_vm2 = vcmp.gt.f32.partialorder %v30_v4, %v35_v5 }
  0x8b   :  { %v61_v6 = vsel %vm37_vm1, 1.0, %v91_v1  ;;  %v62_v7 = vsel %vm38_vm2, 1.0, %v91_v1 }
  0x8c   :  { %v44_v8 = vadd.f32 %v62_v7, %v61_v6 }
  0x8e   :  { %45 = vadd.xlane.f32.xlu0 %v44_v8 }
 0x117   :  { %v46_v10 = vpop.xlane.xlu0 %45 }
 0x118   :  { %v47_v11 = vadd.f32 %v46_v10, %v39_v9 }
 0x11a   :  { %49 = vst.msk [vmem:[%s133_s2] sm:$0xff] %vm27_vm0, %v47_v11 }
 0x121   :  { %v53_v12 = vld [vmem:[%s133_s2] sm:$0xff] }
 0x122   :  { %v54_v13 = vmul.f32 0.00390625, %v53_v12 }
 0x124   :  { %55 = vst.msk [vmem:[%s133_s2] sm:$0xff] %vm27_vm0, %v54_v13 }
 0x125   :  { %60 = vsyncpa [#allocation3], 1 }

</bundles_post_ra>
